<compile_context>
chip_gen: v7x
topology: tpu7x:2x2x1
jax: 0.10.0
libtpu: 0.0.40
codegen_flags: <defaults>
</compile_context>

<pallas_src>
import functools
import numpy as np
import jax
import jax.numpy as jnp
from jax import lax
from jax.experimental import pallas as pl
from jax.experimental.pallas import tpu as pltpu


def _pos_enc_kernel(x_ref, w_ref, p_ref, out_ref, *, n_passthrough):
    """out[b, c] = pre[b, c]        for c <  n_passthrough  (raw input copy)
                 = sin(pre[b, c])   otherwise
    with pre[b, c] = sum_k x[b, k] * W[k, c] + P[c].

    W is the (d_in, d_out) scatter matrix (identity block for the passthrough
    columns, per-column frequency for the encoding columns); each column has
    exactly one nonzero, so the rank-1 broadcast-FMA form is bit-exact f32
    (matches torch.addcmul(phases, x_rep, freqs) rounding) and never touches
    the MXU.
    """
    x = x_ref[...].astype(jnp.float32)            # (TB, d_in)
    w = w_ref[...]                                # (d_in, d_out)
    p = p_ref[...]                                # (1, d_out)

    d_in = w.shape[0]
    pre = x[:, 0:1] * w[0:1, :]                   # (TB, d_out)
    for k in range(1, d_in):
        pre = pre + x[:, k:k + 1] * w[k:k + 1, :]
    pre = pre + p

    val = jnp.sin(pre)
    if n_passthrough > 0:
        col = lax.broadcasted_iota(jnp.int32, (1, pre.shape[1]), 1)
        val = jnp.where(col < n_passthrough, pre, val)
    out_ref[...] = val.astype(out_ref.dtype)


class PositionalEncodingPallas:
    """NeRF positional encoding: out = [x, sin(f0*x), cos(f0*x), ..., cos(f_{F-1}*x)]
    flattened exactly like the torch module's view(B, -1) + cat."""

    def __init__(self, num_freqs=6, d_in=3, freq_factor=np.pi, include_input=True):
        self.num_freqs = num_freqs
        self.d_in = d_in
        self.include_input = include_input

        M = 2 * num_freqs * d_in
        self.M = M
        self.d_out = M + (d_in if include_input else 0)

        freqs = (freq_factor * 2.0 ** np.arange(num_freqs)).astype(np.float32)   # (F,)
        freqs_rep = np.repeat(freqs, 2)                                           # (2F,)
        phases = np.zeros(2 * num_freqs, dtype=np.float32)
        phases[1::2] = np.pi * 0.5                                                # (2F,)

        # Encoding columns: c = p*d_in + dim  (p = 2F-pair index, dim = input dim)
        w_enc = np.zeros((d_in, M), dtype=np.float32)
        for c in range(M):
            w_enc[c % d_in, c] = freqs_rep[c // d_in]
        p_enc = np.repeat(phases, d_in).astype(np.float32)                        # (M,)

        if include_input:
            w_full = np.concatenate([np.eye(d_in, dtype=np.float32), w_enc], axis=1)
            p_full = np.concatenate([np.zeros(d_in, np.float32), p_enc])
        else:
            w_full, p_full = w_enc, p_enc

        self.W = jnp.asarray(w_full)                 # (d_in, d_out)
        self.P = jnp.asarray(p_full[None, :])        # (1, d_out)

    def __call__(self, x, tile_b=2048):
        B, d_in = x.shape
        assert d_in == self.d_in, (d_in, self.d_in)
        d_out = self.d_out

        # Batch tile: big enough to amortize per-grid-step overhead, rounded to
        # a sublane multiple, never larger than the (padded) batch.
        tile = int(min(int(tile_b), pl.cdiv(B, 8) * 8))
        tile = max(8, (tile // 8) * 8)
        b_pad = pl.cdiv(B, tile) * tile
        xp = x if b_pad == B else jnp.pad(x, ((0, b_pad - B), (0, 0)))

        kernel = functools.partial(
            _pos_enc_kernel,
            n_passthrough=self.d_in if self.include_input else 0)

        cost = pl.CostEstimate(
            flops=int(4 * b_pad * d_out),
            transcendentals=int(b_pad * d_out),
            bytes_accessed=int(b_pad * (d_in + d_out) * 4))

        out = pl.pallas_call(
            kernel,
            out_shape=jax.ShapeDtypeStruct((b_pad, d_out), x.dtype),
            grid_spec=pltpu.PrefetchScalarGridSpec(
                num_scalar_prefetch=0,
                grid=(b_pad // tile,),
                in_specs=[
                    pl.BlockSpec((tile, d_in), lambda i: (i, 0)),
                    pl.BlockSpec((self.d_in, d_out), lambda i: (0, 0)),
                    pl.BlockSpec((1, d_out), lambda i: (0, 0)),
                ],
                out_specs=pl.BlockSpec((tile, d_out), lambda i: (i, 0)),
            ),
            compiler_params=pltpu.CompilerParams(
                dimension_semantics=("parallel",),
                vmem_limit_bytes=32 * 1024 * 1024),
            cost_estimate=cost,
        )(xp, self.W, self.P)

        return out if b_pad == B else out[:B]


def _reference(x, num_freqs=6, d_in=3, freq_factor=np.pi, include_input=True):
    """Pure-JAX reference mirroring the torch forward exactly."""
    freqs = freq_factor * 2.0 ** jnp.arange(num_freqs, dtype=jnp.float32)
    freqs_rep = jnp.repeat(freqs, 2).reshape(1, -1, 1)          # (1, 2F, 1)
    phases = jnp.zeros(2 * num_freqs, dtype=jnp.float32)
    phases = phases.at[1::2].set(jnp.pi * 0.5).reshape(1, -1, 1)
    embed = jnp.repeat(x[:, None, :], 2 * num_freqs, axis=1)    # (B, 2F, d_in)
    embed = jnp.sin(phases + embed * freqs_rep)
    embed = embed.reshape(x.shape[0], -1)
    if include_input:
        embed = jnp.concatenate([x, embed], axis=-1)
    return embed


if __name__ == "__main__":
    key = jax.random.PRNGKey(0)
    B, d_in, num_freqs = 50, 3, 6            # B=50 exercises the pad/slice path
    x = jax.random.normal(key, (B, d_in), dtype=jnp.float32)

    pe = PositionalEncodingPallas(num_freqs=num_freqs, d_in=d_in,
                                  freq_factor=np.pi, include_input=True)
    out = jax.block_until_ready(pe(x))

    ref = jax.block_until_ready(
        _reference(x, num_freqs=num_freqs, d_in=d_in,
                   freq_factor=np.pi, include_input=True))

    assert out.shape == (B, pe.d_out), (out.shape, pe.d_out)
    np.testing.assert_allclose(np.asarray(out), np.asarray(ref),
                               rtol=1e-5, atol=1e-5)
    print("KERNEL_OK")
</pallas_src>

<mosaic_0001>
module attributes {stable_mosaic.version = 11 : i64} {
  func.func @_pos_enc_kernel(%arg0: i32, %arg1: memref<56x3xf32, #tpu.memory_space<vmem>>, %arg2: memref<3x39xf32, #tpu.memory_space<vmem>>, %arg3: memref<1x39xf32, #tpu.memory_space<vmem>>, %arg4: memref<56x39xf32, #tpu.memory_space<vmem>>) attributes {dimension_semantics = [#tpu.dimension_semantics<parallel>], iteration_bounds = array<i64: 1>, scalar_prefetch = 0 : i64, scratch_operands = 0 : i64, tpu.core_type = #tpu.core_type<tc>, window_params = [{transform_indices = @transform_0, window_bounds = array<i64: 56, 3>}, {pipeline_mode = #tpu.pipeline_mode<synchronous>, transform_indices = @transform_1, window_bounds = array<i64: 3, 39>}, {pipeline_mode = #tpu.pipeline_mode<synchronous>, transform_indices = @transform_2, window_bounds = array<i64: 1, 39>}, {transform_indices = @transform_3, window_bounds = array<i64: 56, 39>}]} {
    %c0 = arith.constant 0 : index
    %c0_0 = arith.constant 0 : index
    %0 = vector.load %arg1[%c0, %c0_0] : memref<56x3xf32, #tpu.memory_space<vmem>>, vector<56x3xf32>
    %c0_1 = arith.constant 0 : index
    %c0_2 = arith.constant 0 : index
    %1 = vector.load %arg2[%c0_1, %c0_2] : memref<3x39xf32, #tpu.memory_space<vmem>>, vector<3x39xf32>
    %c0_3 = arith.constant 0 : index
    %c0_4 = arith.constant 0 : index
    %2 = vector.load %arg3[%c0_3, %c0_4] : memref<1x39xf32, #tpu.memory_space<vmem>>, vector<1x39xf32>
    %3 = vector.extract_strided_slice %0 {offsets = [0, 0], sizes = [56, 1], strides = [1, 1]} : vector<56x3xf32> to vector<56x1xf32>
    %4 = vector.extract_strided_slice %1 {offsets = [0, 0], sizes = [1, 39], strides = [1, 1]} : vector<3x39xf32> to vector<1x39xf32>
    %5 = vector.broadcast %3 : vector<56x1xf32> to vector<56x39xf32>
    %6 = vector.broadcast %4 : vector<1x39xf32> to vector<56x39xf32>
    %7 = arith.mulf %5, %6 : vector<56x39xf32>
    %8 = vector.extract_strided_slice %0 {offsets = [0, 1], sizes = [56, 1], strides = [1, 1]} : vector<56x3xf32> to vector<56x1xf32>
    %9 = vector.extract_strided_slice %1 {offsets = [1, 0], sizes = [1, 39], strides = [1, 1]} : vector<3x39xf32> to vector<1x39xf32>
    %10 = vector.broadcast %8 : vector<56x1xf32> to vector<56x39xf32>
    %11 = vector.broadcast %9 : vector<1x39xf32> to vector<56x39xf32>
    %12 = arith.mulf %10, %11 : vector<56x39xf32>
    %13 = arith.addf %7, %12 : vector<56x39xf32>
    %14 = vector.extract_strided_slice %0 {offsets = [0, 2], sizes = [56, 1], strides = [1, 1]} : vector<56x3xf32> to vector<56x1xf32>
    %15 = vector.extract_strided_slice %1 {offsets = [2, 0], sizes = [1, 39], strides = [1, 1]} : vector<3x39xf32> to vector<1x39xf32>
    %16 = vector.broadcast %14 : vector<56x1xf32> to vector<56x39xf32>
    %17 = vector.broadcast %15 : vector<1x39xf32> to vector<56x39xf32>
    %18 = arith.mulf %16, %17 : vector<56x39xf32>
    %19 = arith.addf %13, %18 : vector<56x39xf32>
    %20 = vector.broadcast %2 : vector<1x39xf32> to vector<56x39xf32>
    %21 = arith.addf %19, %20 : vector<56x39xf32>
    %22 = math.sin %21 : vector<56x39xf32>
    %23 = tpu.iota {dimensions = array<i32: 1>} : vector<1x39xi32>
    %c3_i32 = arith.constant 3 : i32
    %24 = vector.broadcast %c3_i32 : i32 to vector<1x39xi32>
    %25 = arith.cmpi slt, %23, %24 : vector<1x39xi32>
    %26 = vector.shape_cast %25 : vector<1x39xi1> to vector<1x39xi1>
    %27 = vector.broadcast %26 : vector<1x39xi1> to vector<56x39xi1>
    %28 = arith.select %27, %21, %22 : vector<56x39xi1>, vector<56x39xf32>
    %c0_5 = arith.constant 0 : index
    %c0_6 = arith.constant 0 : index
    %29 = vector.load %arg4[%c0_5, %c0_6] : memref<56x39xf32, #tpu.memory_space<vmem>>, vector<56x39xf32>
    tpu.vector_store %arg4[%c0_5, %c0_6], %28 {strides = array<i32>} : memref<56x39xf32, #tpu.memory_space<vmem>>, vector<56x39xf32>,
    return
  }
  func.func @transform_0(%arg0: i32) -> (i32, i32) {
    %c0_i32 = arith.constant 0 : i32
    %c0_i32_0 = arith.constant 0 : i32
    return %arg0, %c0_i32 : i32, i32
  }
  func.func @transform_1(%arg0: i32) -> (i32, i32) {
    %c0_i32 = arith.constant 0 : i32
    %c0_i32_0 = arith.constant 0 : i32
    %c0_i32_1 = arith.constant 0 : i32
    return %c0_i32, %c0_i32_0 : i32, i32
  }
  func.func @transform_2(%arg0: i32) -> (i32, i32) {
    %c0_i32 = arith.constant 0 : i32
    %c0_i32_0 = arith.constant 0 : i32
    %c0_i32_1 = arith.constant 0 : i32
    return %c0_i32, %c0_i32_0 : i32, i32
  }
  func.func @transform_3(%arg0: i32) -> (i32, i32) {
    %c0_i32 = arith.constant 0 : i32
    %c0_i32_0 = arith.constant 0 : i32
    return %arg0, %c0_i32 : i32, i32
  }
}

</mosaic_0001>

<bundles_post_ra>
// kernel: tpu_custom_call.1
= control target key start
LH: loop header
LB: loop body
LE: loop exit
PB: predicated region body
PF: predicated region fallthrough
CT: control target
= control target key end

     0   :  { %v1027_v0 = vmov 0   ;;  %v1028_v8 = vmov 1   ;;  %v1029_v9 = vmov 2   ;;  %v58_v10 = vlaneseq  ;;  %s1663_s0 = inlined_call_operand.vmem [shape: f32[56,3], index: 0, kind: input, shape index: {}]   ;;  %s1664_s1 = inlined_call_operand.vmem [shape: f32[3,39], index: 1, kind: input, shape index: {}]   ;;  %s1665_s2 = inlined_call_operand.vmem [shape: f32[1,39], index: 2, kind: input, shape index: {}]   ;;  %s1666_s3 = inlined_call_operand.vmem [shape: f32[56,39], index: 3, kind: output, shape index: {}]  }
   0x1   :  { %993 = vset.pattern.permute.xlu1 %v1027_v0  ;;  %992 = vset.pattern.permute.xlu0 %v1027_v0  ;;  %v16_v1 = vld [vmem:[%s1663_s0 + $0x10] sm:$0xff]  ;;  %v14_v2 = vld [vmem:[%s1663_s0] sm:$0xff]  ;;  %v17_v3 = vld [vmem:[%s1663_s0 + $0x18] sm:$0xff] }
   0x2   :  { %35 = vperm.xlu1 %993, %v16_v1   ;;  %25 = vperm.xlu0 %992, %v14_v2   ;;  %v15_v4 = vld [vmem:[%s1663_s0 + $0x8] sm:$0xff]  ;;  %v18_v6 = vld [vmem:[%s1663_s0 + $0x20] sm:$0xff]  ;;  %v20_v7 = vld [vmem:[%s1663_s0 + $0x30] sm:$0xff]  ;;  %v59_v11 = vshrl.u32 %v58_v10, 7 }
   0x3   :  { %v19_v5 = vld [vmem:[%s1663_s0 + $0x28] sm:$0xff]  ;;  %v21_v13 = vld [vmem:[%s1664_s1] sm:$0x7] }
   0x4   :  { %v60_v12 = vsub.s32 0, %v59_v11  ;;  %v99_v26 = vsub.s32 1, %v59_v11  ;;  %v145_v33 = vsub.s32 2, %v59_v11  ;;  %v1094_v52 = vld [vmem:[%s1665_s2] ss:$0 sm:$0xff] }
   0x6   :  { %40 = vperm.xlu1 %993, %v17_v3   ;;  %30 = vperm.xlu0 %992, %v15_v4   ;;  %v61_v16 = vrot.slane %v21_v13, %v60_v12  ;;  %v100_v29 = vrot.slane %v21_v13, %v99_v26  ;;  %v1083_v41 = vrot.slane %v21_v13, %v145_v33 }
   0xa   :  { %50 = vperm.xlu1 %993, %v19_v5   ;;  %45 = vperm.xlu0 %992, %v18_v6  }
   0xe   :  { %994 = vset.pattern.permute.xlu1 %v1028_v8  ;;  %55 = vperm.xlu0 %992, %v20_v7  }
   0xf   :  { %70 = vperm.xlu1 %994, %v14_v2  }
  0x12   :  { %995 = vset.pattern.permute.xlu0 %v1028_v8 }
  0x13   :  { %78 = vperm.xlu1 %994, %v16_v1   ;;  %74 = vperm.xlu0 %995, %v15_v4  }
  0x17   :  { %82 = vperm.xlu1 %994, %v17_v3   ;;  %86 = vperm.xlu0 %995, %v18_v6  }
  0x1b   :  { %90 = vperm.xlu1 %994, %v19_v5   ;;  %94 = vperm.xlu0 %995, %v20_v7  }
  0x1f   :  { %996 = vset.pattern.permute.xlu1 %v1029_v9  ;;  %997 = vset.pattern.permute.xlu0 %v1029_v9 }
  0x20   :  { %116 = vperm.xlu1 %996, %v14_v2   ;;  %120 = vperm.xlu0 %997, %v15_v4  }
  0x24   :  { %124 = vperm.xlu1 %996, %v16_v1   ;;  %132 = vperm.xlu0 %997, %v18_v6  }
  0x28   :  { %128 = vperm.xlu1 %996, %v17_v3   ;;  %140 = vperm.xlu0 %997, %v20_v7  }
  0x2c   :  { %136 = vperm.xlu1 %996, %v19_v5  }
  0x81   :  { %v36_v14 = vpop.permute.xlu1 %35  ;;  %v26_v15 = vpop.permute.xlu0 %25 }
  0x82   :  { %v62_v44 = vmul.f32 %v61_v16, %v26_v15  ;;  %v64_v57 = vmul.f32 %v61_v16, %v36_v14 }
  0x85   :  { %v41_v17 = vpop.permute.xlu1 %40  ;;  %v31_v18 = vpop.permute.xlu0 %30 }
  0x86   :  { %v65_v19 = vmul.f32 %v61_v16, %v41_v17  ;;  %v63_v45 = vmul.f32 %v61_v16, %v31_v18 }
  0x89   :  { %v51_v20 = vpop.permute.xlu1 %50  ;;  %v46_v21 = vpop.permute.xlu0 %45 }
  0x8a   :  { %v67_v22 = vmul.f32 %v61_v16, %v51_v20  ;;  %v66_v13 = vmul.f32 %v61_v16, %v46_v21 }
  0x8d   :  { %v56_v23 = vpop.permute.xlu0 %55 }
  0x8e   :  { %v68_v24 = vmul.f32 %v61_v16, %v56_v23  ;;  %v71_v25 = vpop.permute.xlu1 %70 }
  0x8f   :  { %v101_v39 = vmul.f32 %v100_v29, %v71_v25 }
  0x91   :  { %v108_v48 = vadd.f32 %v101_v39, %v62_v44  ;;  %v1032_v39 = vmov 2131351028   ;;  %v1033_v44 = vmov 2102212464  }
  0x92   :  { %v79_v27 = vpop.permute.xlu1 %78  ;;  %v75_v28 = vpop.permute.xlu0 %74 }
  0x93   :  { %v102_v40 = vmul.f32 %v100_v29, %v75_v28  ;;  %v103_v53 = vmul.f32 %v100_v29, %v79_v27 }
  0x95   :  { %v109_v49 = vadd.f32 %v102_v40, %v63_v45  ;;  %v110_v61 = vadd.f32 %v103_v53, %v64_v57 }
  0x96   :  { %v83_v30 = vpop.permute.xlu1 %82  ;;  %v87_v31 = vpop.permute.xlu0 %86 }
  0x97   :  { %v104_v32 = vmul.f32 %v100_v29, %v83_v30  ;;  %v105_v8 = vmul.f32 %v100_v29, %v87_v31 }
  0x99   :  { %v1081_v34 = vadd.f32 %v104_v32, %v65_v19  ;;  %v1030_v32 = vmov 683565275  }
  0x9a   :  { %v91_v35 = vpop.permute.xlu1 %90  ;;  %v95_v36 = vpop.permute.xlu0 %94 }
  0x9b   :  { %v106_v37 = vmul.f32 %v100_v29, %v91_v35  ;;  %v107_v38 = vmul.f32 %v100_v29, %v95_v36 }
  0x9d   :  { %v1085_v42 = vadd.f32 %v106_v37, %v67_v22  ;;  %v1087_v43 = vadd.f32 %v107_v38, %v68_v24  ;;  %v112_v22 = vadd.f32 %v105_v8, %v66_v13  ;;  %v1031_v37 = vmov 2475754826  }
  0x9f   :  { %v117_v46 = vpop.permute.xlu1 %116  ;;  %v121_v47 = vpop.permute.xlu0 %120 }
  0xa0   :  { %v147_v50 = vmul.f32 %v1083_v41, %v117_v46  ;;  %v148_v51 = vmul.f32 %v1083_v41, %v121_v47  ;;  %v1034_v46 = vmov 920167782  }
  0xa2   :  { %v154_v54 = vadd.f32 %v147_v50, %v108_v48  ;;  %v155_v55 = vadd.f32 %v148_v51, %v109_v49 }
  0xa3   :  { %v125_v56 = vpop.permute.xlu1 %124  ;;  %v133_v7 = vpop.permute.xlu0 %132 }
  0xa4   :  { %v1097_v58 = vadd.f32 %v1094_v52, %v154_v54  ;;  %v1100_v59 = vadd.f32 %v1094_v52, %v155_v55  ;;  %v149_v60 = vmul.f32 %v1083_v41, %v125_v56  ;;  %v151_v15 = vmul.f32 %v1083_v41, %v133_v7 }
  0xa5   :  { %v1035_v54 = vmov 1326507024  }
  0xa6   :  { %v174_v62 = vand.u32 2147483647, %v1097_v58  ;;  %v177_v63 = vand.u32 2139095040, %v1097_v58  ;;  %v278_v0 = vand.u32 2147483647, %v1100_v59  ;;  %v281_v1 = vand.u32 2139095040, %v1100_v59 }
  0xa7   :  { %v156_v3 = vadd.f32 %v149_v60, %v110_v61  ;;  %v1116_v28 = vadd.f32 %v151_v15, %v112_v22  ;;  %vm176_vm14 = vcmp.lt.s32.totalorder %v1097_v58, 0  ;;  %vm280_vm15 = vcmp.lt.s32.totalorder %v1100_v59, 0 }
  0xa8   :  { %v178_v2 = vshrl.u32 %v177_v63, 23  ;;  %v181_v4 = vand.u32 8388607, %v174_v62  ;;  %v282_v5 = vshrl.u32 %v281_v1, 23  ;;  %v285_v6 = vand.u32 8388607, %v278_v0 }
  0xa9   :  { %v1112_v11 = vadd.f32 %v1094_v52, %v156_v3  ;;  %vm1202_vm13 = vcmp.le.f32.partialorder %v174_v62, 0.7853982 }
  0xaa   :  { %v927_v9 = vadd.s32 4294967169, %v178_v2  ;;  %v931_v12 = vadd.s32 4294967169, %v282_v5  ;;  %v182_v17 = vor.u32 8388608, %v181_v4  ;;  %v286_v18 = vor.u32 8388608, %v285_v6 }
  0xab   :  { %v385_v20 = vand.u32 2139095040, %v1112_v11  ;;  %v382_v30 = vand.u32 2147483647, %v1112_v11 }
  0xac   :  { %v184_v14 = vadd.s32 1, %v927_v9  ;;  %v288_v19 = vadd.s32 1, %v931_v12  ;;  %v1118_v29 = vshll.u32 %v182_v17, 8  ;;  %v1122_v21 = vshll.u32 %v286_v18, 8 }
  0xad   :  { %v386_v24 = vshrl.u32 %v385_v20, 23 }
  0xae   :  { %vm185_vm0 = vcmp.gt.s32.totalorder %v184_v14, 0  ;;  %vm289_vm1 = vcmp.gt.s32.totalorder %v288_v19, 0 }
  0xaf   :  { %v186_v23 = vsel %vm185_vm0, %v184_v14, 0  ;;  %v290_v27 = vsel %vm289_vm1, %v288_v19, 0  ;;  %v1126_v36 = vadd.s32 4294967169, %v386_v24 }
  0xb0   :  { %v187_v25 = vshrl.u32 %v186_v23, 5  ;;  %v188_v26 = vand.u32 31, %v186_v23  ;;  %v1120_v16 = vshrl.u32 %v290_v27, 5  ;;  %v292_v35 = vand.u32 31, %v290_v27 }
  0xb2   :  { %v189_v31 = vsub.s32 32, %v188_v26  ;;  %v191_v33 = vshll.u32 %v1030_v32, %v188_v26  ;;  %v194_v38 = vshll.u32 %v1031_v37, %v188_v26  ;;  %v197_v40 = vshll.u32 %v1032_v39, %v188_v26 }
  0xb3   :  { %v200_v45 = vshll.u32 %v1033_v44, %v188_v26  ;;  %v203_v47 = vshll.u32 %v1034_v46, %v188_v26  ;;  %vm206_vm2 = vcmp.lt.s32.totalorder %v187_v25, 1  ;;  %vm207_vm3 = vcmp.lt.s32.totalorder %v187_v25, 2 }
  0xb4   :  { %v192_v48 = vshrl.u32 %v1031_v37, %v189_v31  ;;  %v195_v49 = vshrl.u32 %v1032_v39, %v189_v31  ;;  %v198_v50 = vshrl.u32 %v1033_v44, %v189_v31  ;;  %v190_v51 = vshrl.u32 %v1030_v32, %v189_v31 }
  0xb5   :  { %v201_v53 = vshrl.u32 %v1034_v46, %v189_v31  ;;  %v204_v55 = vshrl.u32 %v1035_v54, %v189_v31  ;;  %v293_v61 = vsub.s32 32, %v292_v35  ;;  %vm208_vm4 = vcmp.lt.s32.totalorder %v187_v25, 3 }
  0xb6   :  { %v193_v56 = vor.u32 %v192_v48, %v191_v33  ;;  %v196_v57 = vor.u32 %v195_v49, %v194_v38  ;;  %v199_v60 = vor.u32 %v198_v50, %v197_v40  ;;  %vm209_vm5 = vcmp.lt.s32.totalorder %v187_v25, 4 }
  0xb7   :  { %v202_v63 = vor.u32 %v201_v53, %v200_v45  ;;  %v205_v1 = vor.u32 %v204_v55, %v203_v47  ;;  %v295_v9 = vshll.u32 %v1030_v32, %v292_v35  ;;  %v296_v14 = vshrl.u32 %v1031_v37, %v293_v61 }
  0xb8   :  { %v210_v2 = vsel %vm206_vm2, %v190_v51, %v193_v56  ;;  %v211_v3 = vsel %vm209_vm5, %v199_v60, 2102212464  ;;  %v214_v4 = vsel %vm206_vm2, %v193_v56, %v196_v57  ;;  %v218_v5 = vsel %vm206_vm2, %v196_v57, %v199_v60 }
  0xb9   :  { %v212_v6 = vsel %vm208_vm4, %v196_v57, %v211_v3  ;;  %v215_v7 = vsel %vm209_vm5, %v202_v63, 920167782  ;;  %v219_v8 = vsel %vm209_vm5, %v205_v1, 1326507024  ;;  %v298_v15 = vshll.u32 %v1031_v37, %v292_v35 }
  0xba   :  { %v216_v12 = vsel %vm208_vm4, %v199_v60, %v215_v7  ;;  %v220_v13 = vsel %vm208_vm4, %v202_v63, %v219_v8  ;;  %v213_v17 = vsel %vm207_vm3, %v210_v2, %v212_v6  ;;  %v299_v20 = vshrl.u32 %v1032_v39, %v293_v61 }
  0xbb   :  { %v217_v18 = vsel %vm207_vm3, %v214_v4, %v216_v12  ;;  %v221_v19 = vsel %vm207_vm3, %v218_v5, %v220_v13  ;;  %v297_v27 = vor.u32 %v296_v14, %v295_v9  ;;  %v301_v33 = vshll.u32 %v1032_v39, %v292_v35 }
  0xbc   :  { %v1149_v22 = vmul.u32.u64.low %v1118_v29, %v221_v19  ;;  %v1150_v23 = vmul.u32.u64.high %v1118_v29, %v221_v19, %v1149_v22  ;;  %v1153_v24 = vmul.u32.u64.low %v1118_v29, %v217_v18  ;;  %v1154_v26 = vmul.u32.u64.high %v1118_v29, %v217_v18, %v1153_v24 }
  0xbd   :  { %v300_v31 = vor.u32 %v299_v20, %v298_v15  ;;  %v302_v38 = vshrl.u32 %v1033_v44, %v293_v61  ;;  %v294_v40 = vshrl.u32 %v1030_v32, %v293_v61  ;;  %v304_v25 = vshll.u32 %v1033_v44, %v292_v35 }
  0xbe   :  { %v305_v45 = vshrl.u32 %v1034_v46, %v293_v61  ;;  %v308_v47 = vshrl.u32 %v1035_v54, %v293_v61  ;;  %v229_v48 = vmul.u32 %v1118_v29, %v213_v17  ;;  %v307_v50 = vshll.u32 %v1034_v46, %v292_v35 }
  0xbf   :  { %v303_v49 = vor.u32 %v302_v38, %v301_v33  ;;  %vm310_vm6 = vcmp.lt.s32.totalorder %v1120_v16, 1  ;;  %vm231_vm7 = vc.u32 %v1150_v23, %v1153_v24  ;;  %v232_v51 = vadd.s32 1, %v1154_v26  ;;  %v129_v38 = vpop.permute.xlu1 %128 }
  0xc0   :  { %v306_v53 = vor.u32 %v305_v45, %v304_v25  ;;  %vm311_vm8 = vcmp.lt.s32.totalorder %v1120_v16, 2  ;;  %v309_v55 = vor.u32 %v308_v47, %v307_v50  ;;  %vm312_vm9 = vcmp.lt.s32.totalorder %v1120_v16, 3 }
  0xc1   :  { %vm313_vm10 = vcmp.lt.s32.totalorder %v1120_v16, 4  ;;  %v318_v56 = vsel %vm310_vm6, %v297_v27, %v300_v31  ;;  %v233_v29 = vsel %vm231_vm7, %v232_v51, %v1154_v26  ;;  %v322_v35 = vsel %vm310_vm6, %v300_v31, %v303_v49 }
  0xc2   :  { %v315_v57 = vsel %vm313_vm10, %v303_v49, 2102212464  ;;  %v319_v60 = vsel %vm313_vm10, %v306_v53, 920167782  ;;  %v234_v61 = vadd.s32 %v233_v29, %v229_v48  ;;  %v314_v63 = vsel %vm310_vm6, %v294_v40, %v297_v27 }
  0xc3   :  { %v320_v1 = vsel %vm312_vm9, %v303_v49, %v319_v60  ;;  %v323_v2 = vsel %vm313_vm10, %v309_v55, 1326507024  ;;  %v316_v3 = vsel %vm312_vm9, %v300_v31, %v315_v57  ;;  %v392_v6 = vadd.s32 1, %v1126_v36 }
  0xc4   :  { %v321_v4 = vsel %vm311_vm8, %v318_v56, %v320_v1  ;;  %v324_v5 = vsel %vm312_vm9, %v306_v53, %v323_v2  ;;  %v235_v7 = vadd.s32 536870912, %v234_v61  ;;  %v389_v15 = vand.u32 8388607, %v382_v30 }
  0xc5   :  { %v325_v8 = vsel %vm311_vm8, %v322_v35, %v324_v5  ;;  %v1177_v9 = vmul.u32.u64.low %v1122_v21, %v321_v4  ;;  %v1178_v12 = vmul.u32.u64.high %v1122_v21, %v321_v4, %v1177_v9  ;;  %vm393_vm11 = vcmp.gt.s32.totalorder %v392_v6, 0 }
  0xc6   :  { %v1182_v13 = vmul.u32.u64.low %v1122_v21, %v325_v8  ;;  %v1183_v14 = vmul.u32.u64.high %v1122_v21, %v325_v8, %v1182_v13  ;;  %v236_v17 = vshrl.u32 %v235_v7, 30  ;;  %v317_v36 = vsel %vm311_vm8, %v314_v63, %v316_v3 }
  0xc7   :  { %v394_v18 = vsel %vm393_vm11, %v392_v6, 0  ;;  %v336_v22 = vadd.s32 1, %v1178_v12  ;;  %v1192_v26 = vadd.f32 %v1094_v52, %v1116_v28  ;;  %v333_v27 = vmul.u32 %v1122_v21, %v317_v36 }
  0xc8   :  { %v396_v19 = vand.u32 31, %v394_v18  ;;  %v237_v20 = vshll.u32 %v236_v17, 30  ;;  %vm335_vm12 = vc.u32 %v1183_v14, %v1177_v9  ;;  %v390_v31 = vor.u32 8388608, %v389_v15 }
  0xc9   :  { %v337_v16 = vsel %vm335_vm12, %v336_v22, %v1178_v12  ;;  %v260_v28 = vsub.s32 4, %v236_v17  ;;  %v230_v45 = vadd.s32 %v1153_v24, %v1150_v23  ;;  %v590_v48 = vand.u32 2147483647, %v1192_v26 }
  0xca   :  { %v397_v33 = vsub.s32 32, %v396_v19  ;;  %v1197_v40 = vsub.s32 %v234_v61, %v237_v20  ;;  %v338_v21 = vadd.s32 %v337_v16, %v333_v27  ;;  %v1211_v49 = vmul.f32 %v1083_v41, %v129_v38 }
  0xcb   :  { %v1214_v62 = vshll.u32 %v390_v31, 8  ;;  %v593_v53 = vand.u32 2139095040, %v1192_v26  ;;  %v1218_v56 = vshrl.u32 %v394_v18, 5  ;;  %v1224_v29 = vsel %vm176_vm14, %v260_v28, %v236_v17 }
  0xcc   :  { %v240_v47 = vsub.s32 0, %v1197_v40  ;;  %v339_v50 = vadd.s32 536870912, %v338_v21  ;;  %v400_v51 = vshrl.u32 %v1031_v37, %v397_v33  ;;  %v403_v23 = vshrl.u32 %v1032_v39, %v397_v33 }
  0xcd   :  { %v406_v24 = vshrl.u32 %v1033_v44, %v397_v33  ;;  %v399_v60 = vshll.u32 %v1030_v32, %v396_v19  ;;  %v409_v35 = vshrl.u32 %v1034_v46, %v397_v33  ;;  %v402_v63 = vshll.u32 %v1031_v37, %v396_v19 }
  0xce   :  { %v928_v55 = vmin.u32 %v240_v47, %v1197_v40  ;;  %v340_v57 = vshrl.u32 %v339_v50, 30  ;;  %v405_v1 = vshll.u32 %v1032_v39, %v396_v19  ;;  %v412_v2 = vshrl.u32 %v1035_v54, %v397_v33 }
  0xcf   :  { %v401_v4 = vor.u32 %v400_v51, %v399_v60  ;;  %v408_v5 = vshll.u32 %v1033_v44, %v396_v19  ;;  %v594_v6 = vshrl.u32 %v593_v53, 23  ;;  %v404_v8 = vor.u32 %v403_v23, %v402_v63 }
  0xd0   :  { %v242_v61 = vclz %v928_v55  ;;  %v341_v3 = vshll.u32 %v340_v57, 30  ;;  %v407_v12 = vor.u32 %v406_v24, %v405_v1  ;;  %v411_v13 = vshll.u32 %v1034_v46, %v396_v19 }
  0xd1   :  { %v263_v15 = vsel %vm1202_vm13, 0, %v1224_v29  ;;  %v398_v36 = vshrl.u32 %v1030_v32, %v397_v33  ;;  %v410_v18 = vor.u32 %v409_v35, %v408_v5  ;;  %v364_v20 = vsub.s32 4, %v340_v57 }
  0xd2   :  { %v929_v7 = vadd.s32 4294967294, %v242_v61  ;;  %v1237_v17 = vsub.s32 %v338_v21, %v341_v3  ;;  %v413_v22 = vor.u32 %v412_v2, %v411_v13  ;;  %vm414_vm1 = vcmp.lt.s32.totalorder %v1218_v56, 1 }
  0xd3   :  { %vm416_vm2 = vcmp.lt.s32.totalorder %v1218_v56, 3  ;;  %vm417_vm3 = vcmp.lt.s32.totalorder %v1218_v56, 4  ;;  %vm1246_vm4 = vcmp.le.f32.partialorder %v278_v0, 0.7853982  ;;  %v422_v28 = vsel %vm414_vm1, %v401_v4, %v404_v8 }
  0xd4   :  { %vm930_vm0 = vcmp.lt.s32.totalorder %v929_v7, 0  ;;  %v344_v31 = vsub.s32 0, %v1237_v17  ;;  %v419_v33 = vsel %vm417_vm3, %v407_v12, 2102212464  ;;  %v423_v50 = vsel %vm417_vm3, %v410_v18, 920167782 }
  0xd5   :  { %v245_v27 = vsel %vm930_vm0, 0, %v929_v7  ;;  %v426_v51 = vsel %vm414_vm1, %v404_v8, %v407_v12  ;;  %v424_v0 = vsel %vm416_vm2, %v407_v12, %v423_v50  ;;  %v427_v23 = vsel %vm417_vm3, %v413_v22, 1326507024 }
  0xd6   :  { %v246_v19 = vsub.s32 32, %v245_v27  ;;  %v250_v38 = vsub.s32 4294967266, %v245_v27  ;;  %v247_v21 = vshll.u32 %v1197_v40, %v245_v27  ;;  %v932_v47 = vmin.u32 %v344_v31, %v1237_v17 }
  0xd7   :  { %vm415_vm5 = vcmp.lt.s32.totalorder %v1218_v56, 2  ;;  %v418_v29 = vsel %vm414_vm1, %v398_v36, %v401_v4  ;;  %v420_v40 = vsel %vm416_vm2, %v404_v8, %v419_v33  ;;  %v365_v7 = vsel %vm280_vm15, %v364_v20, %v340_v57 }
  0xd8   :  { %v248_v53 = vshrl.u32 %v230_v45, %v246_v19  ;;  %v251_v55 = vadd.s32 127, %v250_v38  ;;  %v346_v24 = vclz %v932_v47  ;;  %v425_v61 = vsel %vm415_vm5, %v422_v28, %v424_v0 }
  0xd9   :  { %v428_v45 = vsel %vm416_vm2, %v410_v18, %v427_v23  ;;  %v1266_v2 = vmul.u32.u64.low %v1214_v62, %v425_v61  ;;  %v1267_v3 = vmul.u32.u64.high %v1214_v62, %v425_v61, %v1266_v2  ;;  %v334_v8 = vadd.s32 %v1177_v9, %v1183_v14 }
  0xda   :  { %v249_v60 = vor.u32 %v248_v53, %v247_v21  ;;  %v252_v35 = vshll.u32 %v251_v55, 23  ;;  %v933_v63 = vadd.s32 4294967294, %v346_v24  ;;  %v429_v1 = vsel %vm415_vm5, %v426_v51, %v428_v45  ;;  %v141_v21 = vpop.permute.xlu0 %140 }
  0xdb   :  { %v1272_v4 = vmul.u32.u64.low %v1214_v62, %v429_v1  ;;  %v1273_v12 = vmul.u32.u64.high %v1214_v62, %v429_v1, %v1272_v4  ;;  %v421_v56 = vsel %vm415_vm5, %v418_v29, %v420_v40  ;;  %v943_v13 = vadd.s32 4294967169, %v594_v6 }
  0xdc   :  { %v253_v5 = vor.u32 4788187, %v252_v35  ;;  %vm934_vm6 = vcmp.lt.s32.totalorder %v933_v63, 0  ;;  %v256_v18 = vcvt.s32.f32 %v249_v60  ;;  %v267_v22 = vadd.s32 3, %v263_v15 }
  0xdd   :  { %v349_v27 = vsel %vm934_vm6, 0, %v933_v63  ;;  %v367_v38 = vsel %vm1246_vm4, 0, %v365_v7  ;;  %v440_v57 = vadd.s32 1, %v1267_v3  ;;  %v437_v33 = vmul.u32 %v1214_v62, %v421_v56 }
  0xde   :  { %v254_v36 = vand.u32 2147483647, %v253_v5  ;;  %v350_v31 = vsub.s32 32, %v349_v27  ;;  %v354_v19 = vsub.s32 4294967266, %v349_v27  ;;  %vm439_vm7 = vc.u32 %v1273_v12, %v1266_v2 }
  0xdf   :  { %v600_v9 = vadd.s32 1, %v943_v13  ;;  %v351_v14 = vshll.u32 %v1237_v17, %v349_v27  ;;  %v441_v15 = vsel %vm439_vm7, %v440_v57, %v1267_v3  ;;  %v597_v51 = vand.u32 8388607, %v590_v48 }
  0xe0   :  { %v257_v20 = vmul.f32 %v256_v18, %v254_v36  ;;  %v352_v6 = vshrl.u32 %v334_v8, %v350_v31  ;;  %v355_v28 = vadd.s32 127, %v354_v19  ;;  %v442_v50 = vadd.s32 %v441_v15, %v437_v33 }
  0xe1   :  { %vm601_vm8 = vcmp.gt.s32.totalorder %v600_v9, 0  ;;  %v371_v0 = vadd.s32 3, %v367_v38  ;;  %v153_v29 = vmul.f32 %v1083_v41, %v141_v21  ;;  %v1290_v40 = vand.u32 127, %v58_v10 }
  0xe2   :  { %v258_v47 = vxor.u32 2147483648, %v257_v20  ;;  %v353_v53 = vor.u32 %v352_v6, %v351_v14  ;;  %v356_v55 = vshll.u32 %v355_v28, 23  ;;  %v602_v62 = vsel %vm601_vm8, %v600_v9, 0 }
  0xe3   :  { %v443_v24 = vadd.s32 536870912, %v442_v50  ;;  %v604_v17 = vand.u32 31, %v602_v62  ;;  %v1295_v35 = vand.u32 3, %v267_v22  ;;  %v598_v63 = vor.u32 8388608, %v597_v51 }
  0xe4   :  { %v259_v23 = vsel %vm176_vm14, %v258_v47, %v257_v20  ;;  %v357_v61 = vor.u32 4788187, %v356_v55  ;;  %v360_v5 = vcvt.s32.f32 %v353_v53  ;;  %v1299_v7 = vand.u32 3, %v371_v0 }
  0xe5   :  { %v262_v60 = vsel %vm1202_vm13, %v1097_v58, %v259_v23  ;;  %v1297_v45 = vshrl.u32 %v443_v24, 30  ;;  %v605_v1 = vsub.s32 32, %v604_v17  ;;  %v157_v25 = vadd.f32 %v1211_v49, %v1081_v34 }
  0xe6   :  { %998 = vcosq.f32 %v262_v60  ;;  %v358_v3 = vand.u32 2147483647, %v357_v61  ;;  %v1306_v8 = vadd.f32 %v153_v29, %v1087_v43  ;;  %v1309_v13 = vadd.s32 %v1266_v2, %v1273_v12 }
  0xe7   :  { %1000 = vsinq.f32 %v262_v60  ;;  %v445_v10 = vshll.u32 %v1297_v45, 30  ;;  %v608_v4 = vshrl.u32 %v1031_v37, %v605_v1  ;;  %v611_v36 = vshrl.u32 %v1032_v39, %v605_v1 }
  0xe8   :  { %v361_v56 = vmul.f32 %v360_v5, %v358_v3  ;;  %v614_v18 = vshrl.u32 %v1033_v44, %v605_v1  ;;  %vm273_vm9 = vcmp.eq.s32.totalorder %v1295_v35, 2  ;;  %v607_v27 = vshll.u32 %v1030_v32, %v604_v17 }
  0xe9   :  { %v1314_v22 = vsub.s32 %v442_v50, %v445_v10  ;;  %v617_v31 = vshrl.u32 %v1034_v46, %v605_v1  ;;  %v1318_v34 = vshll.u32 %v598_v63, 8  ;;  %vm270_vm10 = vcmp.eq.s32.totalorder %v1295_v35, 0 }
  0xea   :  { %v362_v43 = vxor.u32 2147483648, %v361_v56  ;;  %v1321_v49 = vshrl.u32 %v602_v62, 5  ;;  %v610_v2 = vshll.u32 %v1031_v37, %v604_v17  ;;  %v613_v12 = vshll.u32 %v1032_v39, %v604_v17 }
  0xeb   :  { %vm904_vm11 = vcmp.lt.s32.totalorder %v1290_v40, 3  ;;  %vm269_vm12 = vcmp.lt.s32.totalorder %v1295_v35, 2  ;;  %v448_v19 = vsub.s32 0, %v1314_v22  ;;  %v609_v38 = vor.u32 %v608_v4, %v607_v27 }
  0xec   :  { %v616_v57 = vshll.u32 %v1033_v44, %v604_v17  ;;  %v1330_v20 = vadd.f32 %v1094_v52, %v157_v25  ;;  %vm914_vm13 = vcmask 318464   ;;  %vm266_vm14 = vweird.f32 %v1097_v58 }
  0xed   :  { %v363_v33 = vsel %vm280_vm15, %v362_v43, %v361_v56  ;;  %v612_v9 = vor.u32 %v611_v36, %v610_v2  ;;  %v615_v14 = vor.u32 %v614_v18, %v613_v12  ;;  %v620_v6 = vshrl.u32 %v1035_v54, %v605_v1 }
  0xee   :  { %v366_v28 = vsel %vm1246_vm4, %v1100_v59, %v363_v33  ;;  %v936_v15 = vmin.u32 %v448_v19, %v1314_v22  ;;  %v618_v21 = vor.u32 %v617_v31, %v616_v57  ;;  %v619_v47 = vshll.u32 %v1034_v46, %v604_v17 }
  0xef   :  { %1002 = vcosq.f32 %v366_v28  ;;  %v468_v50 = vsub.s32 4, %v1297_v45  ;;  %v606_v51 = vshrl.u32 %v1030_v32, %v605_v1  ;;  %vm622_vm15 = vcmp.lt.s32.totalorder %v1321_v49, 1 }
  0xf0   :  { %v999_v53 = vpop.eup %998  ;;  %1004 = vsinq.f32 %v366_v28  ;;  %vm384_vm0 = vcmp.lt.s32.totalorder %v1112_v11, 0  ;;  %v450_v55 = vclz %v936_v15  ;;  %v621_v0 = vor.u32 %v620_v6, %v619_v47 }
  0xf1   :  { %vm623_vm1 = vcmp.lt.s32.totalorder %v1321_v49, 2  ;;  %v1001_v16 = vpop.eup %1000  ;;  %v274_v62 = vxor.u32 2147483648, %v999_v53  ;;  %vm624_vm2 = vcmp.lt.s32.totalorder %v1321_v49, 3  ;;  %vm625_vm3 = vcmp.lt.s32.totalorder %v1321_v49, 4 }
  0xf2   :  { %v630_v23 = vsel %vm622_vm15, %v609_v38, %v612_v9  ;;  %v271_v24 = vxor.u32 2147483648, %v1001_v16  ;;  %v937_v17 = vadd.s32 4294967294, %v450_v55  ;;  %v627_v29 = vsel %vm625_vm3, %v615_v14, 2102212464 }
  0xf3   :  { %v631_v60 = vsel %vm625_vm3, %v618_v21, 920167782  ;;  %v275_v61 = vsel %vm273_vm9, %v274_v62, %v1001_v16  ;;  %vm1354_vm4 = vcmp.le.f32.partialorder %v382_v30, 0.7853982  ;;  %v626_v1 = vsel %vm622_vm15, %v606_v51, %v609_v38 }
  0xf4   :  { %v632_v3 = vsel %vm624_vm2, %v615_v14, %v631_v60  ;;  %v634_v5 = vsel %vm622_vm15, %v612_v9, %v615_v14  ;;  %v272_v10 = vsel %vm270_vm10, %v999_v53, %v271_v24  ;;  %vm374_vm5 = vcmp.eq.s32.totalorder %v1299_v7, 0 }
  0xf5   :  { %vm938_vm6 = vcmp.lt.s32.totalorder %v937_v17, 0  ;;  %v633_v30 = vsel %vm623_vm1, %v630_v23, %v632_v3  ;;  %v635_v4 = vsel %vm625_vm3, %v621_v0, 1326507024  ;;  %v276_v25 = vsel %vm269_vm12, %v272_v10, %v275_v61 }
  0xf6   :  { %vm373_vm7 = vcmp.lt.s32.totalorder %v1299_v7, 2  ;;  %v453_v56 = vsel %vm938_vm6, 0, %v937_v17  ;;  %v628_v36 = vsel %vm624_vm2, %v612_v9, %v627_v29  ;;  %v636_v18 = vsel %vm624_vm2, %v618_v21, %v635_v4 }
  0xf7   :  { %v277_v27 = vsel %vm266_vm14, nan, %v276_v25  ;;  %vm370_vm8 = vweird.f32 %v1100_v59  ;;  %v454_v31 = vsub.s32 32, %v453_v56  ;;  %v455_v43 = vshll.u32 %v1314_v22, %v453_v56 }
  0xf8   :  { %v458_v2 = vsub.s32 4294967266, %v453_v56  ;;  %v907_v35 = vsel %vm904_vm11, %v1097_v58, %v277_v27  ;;  %v637_v12 = vsel %vm623_vm1, %v634_v5, %v636_v18  ;;  %v469_v14 = vsel %vm384_vm0, %v468_v50, %v1297_v45 }
  0xf9   :  { %v1386_v19 = vmul.u32.u64.low %v1318_v34, %v633_v30  ;;  %v1387_v38 = vmul.u32.u64.high %v1318_v34, %v633_v30, %v1386_v19  ;;  %915 = vst.msk [vmem:[%s1666_s3] sm:$0xff] %vm914_vm13, %v907_v35  ;;  %v456_v57 = vshrl.u32 %v1309_v13, %v454_v31  ;;  %v1003_v58 = vpop.eup %1002  ;;  %v629_v6 = vsel %vm623_vm1, %v626_v1, %v628_v36 }
  0xfa   :  { %v459_v22 = vadd.s32 127, %v458_v2  ;;  %v1395_v33 = vmul.u32.u64.low %v1318_v34, %v637_v12  ;;  %v1396_v9 = vmul.u32.u64.high %v1318_v34, %v637_v12, %v1395_v33  ;;  %v486_v28 = vand.u32 2147483647, %v1330_v20  ;;  %v1005_v21 = vpop.eup %1004 }
  0xfb   :  { %v489_v15 = vand.u32 2139095040, %v1330_v20  ;;  %vm377_vm9 = vcmp.eq.s32.totalorder %v1299_v7, 2  ;;  %v378_v13 = vxor.u32 2147483648, %v1003_v58  ;;  %v457_v47 = vor.u32 %v456_v57, %v455_v43 }
  0xfc   :  { %v460_v51 = vshll.u32 %v459_v22, 23  ;;  %v375_v53 = vxor.u32 2147483648, %v1005_v21  ;;  %v648_v55 = vadd.s32 1, %v1387_v38  ;;  %v1409_v45 = vadd.f32 %v1094_v52, %v1306_v8 }
  0xfd   :  { %v490_v0 = vshrl.u32 %v489_v15, 23  ;;  %v379_v49 = vsel %vm377_vm9, %v378_v13, %v1005_v21  ;;  %v471_v16 = vsel %vm1354_vm4, 0, %v469_v14  ;;  %v645_v62 = vmul.u32 %v1318_v34, %v629_v6  ;;  %v137_v15 = vpop.permute.xlu1 %136 }
  0xfe   :  { %v461_v50 = vor.u32 4788187, %v460_v51  ;;  %v376_v23 = vsel %vm374_vm5, %v1003_v58, %v375_v53  ;;  %vm647_vm10 = vc.u32 %v1396_v9, %v1386_v19  ;;  %v493_v17 = vand.u32 8388607, %v486_v28 }
  0xff   :  { %v939_v24 = vadd.s32 4294967169, %v490_v0  ;;  %v380_v52 = vsel %vm373_vm7, %v376_v23, %v379_v49  ;;  %v464_v29 = vcvt.s32.f32 %v457_v47  ;;  %v649_v60 = vsel %vm647_vm10, %v648_v55, %v1387_v38 }
 0x100   :  { %v462_v8 = vand.u32 2147483647, %v461_v50  ;;  %v381_v61 = vsel %vm370_vm8, nan, %v380_v52  ;;  %v650_v34 = vadd.s32 %v649_v60, %v645_v62  ;;  %v475_v10 = vadd.s32 3, %v471_v16 }
 0x101   :  { %v496_v1 = vadd.s32 1, %v939_v24  ;;  %v908_v3 = vsel %vm904_vm11, %v1100_v59, %v381_v61  ;;  %v494_v30 = vor.u32 8388608, %v493_v17  ;;  %v801_v56 = vand.u32 2139095040, %v1409_v45 }
 0x102   :  { %v465_v5 = vmul.f32 %v464_v29, %v462_v8  ;;  %916 = vst.msk [vmem:[%s1666_s3 + $0x8] sm:$0xff] %vm914_vm13, %v908_v3  ;;  %v651_v7 = vadd.s32 536870912, %v650_v34  ;;  %v1434_v59 = vand.u32 3, %v475_v10  ;;  %vm592_vm14 = vcmp.lt.s32.totalorder %v1192_v26, 0 }
 0x103   :  { %vm497_vm12 = vcmp.gt.s32.totalorder %v496_v1, 0  ;;  %v1438_v31 = vadd.s32 %v1386_v19, %v1396_v9  ;;  %v1443_v12 = vshll.u32 %v494_v30, 8  ;;  %v798_v57 = vand.u32 2147483647, %v1409_v45 }
 0x104   :  { %v466_v4 = vxor.u32 2147483648, %v465_v5  ;;  %v498_v25 = vsel %vm497_vm12, %v496_v1, 0  ;;  %v652_v36 = vshrl.u32 %v651_v7, 30  ;;  %v802_v22 = vshrl.u32 %v801_v56, 23 }
 0x105   :  { %v500_v18 = vand.u32 31, %v498_v25  ;;  %v499_v13 = vshrl.u32 %v498_v25, 5  ;;  %vm481_vm15 = vcmp.eq.s32.totalorder %v1434_v59, 2  ;;  %v1460_v49 = vand.u32 8388607, %v798_v57 }
 0x106   :  { %v467_v27 = vsel %vm384_vm0, %v466_v4, %v465_v5  ;;  %v653_v2 = vshll.u32 %v652_v36, 30  ;;  %v676_v38 = vsub.s32 4, %v652_v36  ;;  %vm478_vm0 = vcmp.eq.s32.totalorder %v1434_v59, 0 }
 0x107   :  { %v470_v43 = vsel %vm1354_vm4, %v1112_v11, %v467_v27  ;;  %v501_v35 = vsub.s32 32, %v500_v18  ;;  %v503_v58 = vshll.u32 %v1030_v32, %v500_v18  ;;  %v506_v19 = vshll.u32 %v1031_v37, %v500_v18 }
 0x108   :  { %1006 = vcosq.f32 %v470_v43  ;;  %v1446_v33 = vsub.s32 %v650_v34, %v653_v2  ;;  %v509_v14 = vshll.u32 %v1032_v39, %v500_v18  ;;  %v512_v47 = vshll.u32 %v1033_v44, %v500_v18 }
 0x109   :  { %1008 = vsinq.f32 %v470_v43  ;;  %v504_v9 = vshrl.u32 %v1031_v37, %v501_v35  ;;  %v507_v63 = vshrl.u32 %v1032_v39, %v501_v35  ;;  %v510_v6 = vshrl.u32 %v1033_v44, %v501_v35 }
 0x10a   :  { %v656_v21 = vsub.s32 0, %v1446_v33  ;;  %v513_v51 = vshrl.u32 %v1034_v46, %v501_v35  ;;  %v516_v62 = vshrl.u32 %v1035_v54, %v501_v35  ;;  %v152_v23 = vmul.f32 %v1083_v41, %v137_v15 }
 0x10b   :  { %v505_v53 = vor.u32 %v504_v9, %v503_v58  ;;  %v508_v55 = vor.u32 %v507_v63, %v506_v19  ;;  %v511_v0 = vor.u32 %v510_v6, %v509_v14  ;;  %vm477_vm1 = vcmp.lt.s32.totalorder %v1434_v59, 2 }
 0x10c   :  { %v944_v50 = vmin.u32 %v656_v21, %v1446_v33  ;;  %v514_v16 = vor.u32 %v513_v51, %v512_v47  ;;  %v1469_v24 = vsel %vm592_vm14, %v676_v38, %v652_v36  ;;  %v502_v17 = vshrl.u32 %v1030_v32, %v501_v35 }
 0x10d   :  { %v515_v52 = vshll.u32 %v1034_v46, %v500_v18  ;;  %v951_v8 = vadd.s32 4294967169, %v802_v22  ;;  %vm474_vm2 = vweird.f32 %v1112_v11  ;;  %vm518_vm3 = vcmp.lt.s32.totalorder %v499_v13, 1 }
 0x10e   :  { %v658_v29 = vclz %v944_v50  ;;  %vm520_vm4 = vcmp.lt.s32.totalorder %v499_v13, 3  ;;  %vm521_vm5 = vcmp.lt.s32.totalorder %v499_v13, 4  ;;  %v522_v61 = vsel %vm518_vm3, %v502_v17, %v505_v53 }
 0x10f   :  { %v517_v60 = vor.u32 %v516_v62, %v515_v52  ;;  %v523_v41 = vsel %vm521_vm5, %v511_v0, 2102212464  ;;  %v526_v34 = vsel %vm518_vm3, %v505_v53, %v508_v55  ;;  %v527_v5 = vsel %vm521_vm5, %v514_v16, 920167782 }
 0x110   :  { %v945_v1 = vadd.s32 4294967294, %v658_v29  ;;  %v524_v3 = vsel %vm520_vm4, %v508_v55, %v523_v41  ;;  %v530_v10 = vsel %vm518_vm3, %v508_v55, %v511_v0  ;;  %vm519_vm6 = vcmp.lt.s32.totalorder %v499_v13, 2 }
 0x111   :  { %v528_v30 = vsel %vm520_vm4, %v511_v0, %v527_v5  ;;  %v531_v4 = vsel %vm521_vm5, %v517_v60, 1326507024  ;;  %v808_v25 = vadd.s32 1, %v951_v8  ;;  %v525_v18 = vsel %vm519_vm6, %v522_v61, %v524_v3 }
 0x112   :  { %v1007_v7 = vpop.eup %1006  ;;  %vm946_vm7 = vcmp.lt.s32.totalorder %v945_v1, 0  ;;  %v532_v27 = vsel %vm520_vm4, %v514_v16, %v531_v4  ;;  %v529_v35 = vsel %vm519_vm6, %v526_v34, %v528_v30  ;;  %vm1493_vm9 = vcmp.le.f32.partialorder %v590_v48, 0.7853982 }
 0x113   :  { %v1009_v56 = vpop.eup %1008  ;;  %v482_v36 = vxor.u32 2147483648, %v1007_v7  ;;  %v661_v2 = vsel %vm946_vm7, 0, %v945_v1  ;;  %v533_v38 = vsel %vm519_vm6, %v530_v10, %v532_v27  ;;  %vm809_vm8 = vcmp.gt.s32.totalorder %v808_v25, 0 }
 0x114   :  { %v479_v43 = vxor.u32 2147483648, %v1009_v56  ;;  %v662_v58 = vsub.s32 32, %v661_v2  ;;  %v663_v19 = vshll.u32 %v1446_v33, %v661_v2  ;;  %v666_v9 = vsub.s32 4294967266, %v661_v2  ;;  %v1026_v33 = vld [vmem:[%s1665_s2] ss:$0 sm:$0xff] }
 0x115   :  { %v483_v22 = vsel %vm481_vm15, %v482_v36, %v1009_v56  ;;  %v1483_v14 = vmul.u32.u64.low %v1443_v12, %v533_v38  ;;  %v1484_v6 = vmul.u32.u64.high %v1443_v12, %v533_v38, %v1483_v14  ;;  %v810_v47 = vsel %vm809_vm8, %v808_v25, 0 }
 0x116   :  { %v480_v63 = vsel %vm478_vm0, %v1007_v7, %v479_v43  ;;  %v664_v21 = vshrl.u32 %v1438_v31, %v662_v58  ;;  %v667_v13 = vadd.s32 127, %v666_v9  ;;  %v812_v50 = vand.u32 31, %v810_v47 }
 0x117   :  { %v484_v15 = vsel %vm477_vm1, %v480_v63, %v483_v22  ;;  %v1498_v53 = vmul.u32.u64.low %v1443_v12, %v529_v35  ;;  %v1499_v55 = vmul.u32.u64.high %v1443_v12, %v529_v35, %v1498_v53  ;;  %v679_v48 = vsel %vm1493_vm9, 0, %v1469_v24 }
 0x118   :  { %v485_v51 = vsel %vm474_vm2, nan, %v484_v15  ;;  %v665_v31 = vor.u32 %v664_v21, %v663_v19  ;;  %v668_v0 = vshll.u32 %v667_v13, 23  ;;  %v541_v16 = vmul.u32 %v1443_v12, %v525_v18 }
 0x119   :  { %v909_v59 = vsel %vm904_vm11, %v1112_v11, %v485_v51  ;;  %v806_v62 = vor.u32 8388608, %v1460_v49  ;;  %v159_v17 = vadd.f32 %v152_v23, %v1085_v42  ;;  %vm543_vm10 = vc.u32 %v1484_v6, %v1498_v53 }
 0x11a   :  { %917 = vst.msk [vmem:[%s1666_s3 + $0x10] sm:$0xff] %vm914_vm13, %v909_v59  ;;  %v669_v52 = vor.u32 4788187, %v668_v0  ;;  %v811_v11 = vshrl.u32 %v810_v47, 5  ;;  %v813_v8 = vsub.s32 32, %v812_v50  ;;  %v672_v29 = vcvt.s32.f32 %v665_v31 }
 0x11b   :  { %v544_v60 = vadd.s32 1, %v1499_v55  ;;  %v815_v61 = vshll.u32 %v1030_v32, %v812_v50  ;;  %v818_v41 = vshll.u32 %v1031_v37, %v812_v50  ;;  %v821_v42 = vshll.u32 %v1032_v39, %v812_v50 }
 0x11c   :  { %v670_v24 = vand.u32 2147483647, %v669_v52  ;;  %v816_v12 = vshrl.u32 %v1031_v37, %v813_v8  ;;  %v819_v49 = vshrl.u32 %v1032_v39, %v813_v8  ;;  %v822_v34 = vshrl.u32 %v1033_v44, %v813_v8 }
 0x11d   :  { %v545_v23 = vsel %vm543_vm10, %v544_v60, %v1499_v55  ;;  %v824_v1 = vshll.u32 %v1033_v44, %v812_v50  ;;  %v825_v3 = vshrl.u32 %v1034_v46, %v813_v8  ;;  %v827_v56 = vshll.u32 %v1034_v46, %v812_v50 }
 0x11e   :  { %v673_v5 = vmul.f32 %v672_v29, %v670_v24  ;;  %v546_v10 = vadd.s32 %v545_v23, %v541_v16  ;;  %v817_v7 = vor.u32 %v816_v12, %v815_v61  ;;  %v820_v30 = vor.u32 %v819_v49, %v818_v41 }
 0x11f   :  { %v823_v4 = vor.u32 %v822_v34, %v821_v42  ;;  %v826_v25 = vor.u32 %v825_v3, %v824_v1  ;;  %v828_v36 = vshrl.u32 %v1035_v54, %v813_v8  ;;  %vm830_vm12 = vcmp.lt.s32.totalorder %v811_v11, 1 }
 0x120   :  { %v674_v18 = vxor.u32 2147483648, %v673_v5  ;;  %v547_v27 = vadd.s32 536870912, %v546_v10  ;;  %vm833_vm15 = vcmp.lt.s32.totalorder %v811_v11, 4  ;;  %vm832_vm0 = vcmp.lt.s32.totalorder %v811_v11, 3 }
 0x121   :  { %v829_v43 = vor.u32 %v828_v36, %v827_v56  ;;  %v838_v2 = vsel %vm830_vm12, %v817_v7, %v820_v30  ;;  %v839_v35 = vsel %vm833_vm15, %v826_v25, 920167782  ;;  %vm831_vm1 = vcmp.lt.s32.totalorder %v811_v11, 2 }
 0x122   :  { %v675_v38 = vsel %vm592_vm14, %v674_v18, %v673_v5  ;;  %v548_v22 = vshrl.u32 %v547_v27, 30  ;;  %v840_v58 = vsel %vm832_vm0, %v823_v4, %v839_v35  ;;  %v814_v9 = vshrl.u32 %v1030_v32, %v813_v8 }
 0x123   :  { %v678_v19 = vsel %vm1493_vm9, %v1192_v26, %v675_v38  ;;  %v835_v63 = vsel %vm833_vm15, %v823_v4, 2102212464  ;;  %v842_v14 = vsel %vm830_vm12, %v820_v30, %v823_v4  ;;  %v841_v21 = vsel %vm831_vm1, %v838_v2, %v840_v58 }
 0x124   :  { %1010 = vcosq.f32 %v678_v19  ;;  %v549_v15 = vshll.u32 %v548_v22, 30  ;;  %v843_v13 = vsel %vm833_vm15, %v829_v43, 1326507024  ;;  %v846_v51 = vshll.u32 %v806_v62, 8 }
 0x125   :  { %1012 = vsinq.f32 %v678_v19  ;;  %v844_v47 = vsel %vm832_vm0, %v826_v25, %v843_v13  ;;  %v1546_v55 = vadd.f32 %v1026_v33, %v159_v17  ;;  %v683_v59 = vadd.s32 3, %v679_v48 }
 0x126   :  { %v550_v31 = vsub.s32 %v546_v10, %v549_v15  ;;  %v845_v0 = vsel %vm831_vm1, %v842_v14, %v844_v47  ;;  %v834_v50 = vsel %vm830_vm12, %v814_v9, %v817_v7  ;;  %v836_v29 = vsel %vm832_vm0, %v820_v30, %v835_v63 }
 0x127   :  { %v1550_v16 = vmul.u32.u64.low %v846_v51, %v845_v0  ;;  %v1551_v52 = vmul.u32.u64.high %v846_v51, %v845_v0, %v1550_v16  ;;  %v1554_v60 = vmul.u32.u64.low %v846_v51, %v841_v21  ;;  %v1555_v62 = vmul.u32.u64.high %v846_v51, %v841_v21, %v1554_v60 }
 0x128   :  { %v552_v8 = vsub.s32 0, %v550_v31  ;;  %v697_v61 = vand.u32 2139095040, %v1546_v55  ;;  %v684_v41 = vand.u32 3, %v683_v59  ;;  %v837_v48 = vsel %vm831_vm1, %v834_v50, %v836_v29 }
 0x129   :  { %vm682_vm14 = vweird.f32 %v1192_v26  ;;  %v572_v49 = vsub.s32 4, %v548_v22  ;;  %vm855_vm2 = vc.u32 %v1551_v52, %v1554_v60  ;;  %vm1563_vm3 = vcmp.le.f32.partialorder %v486_v28, 0.7853982 }
 0x12a   :  { %v940_v17 = vmin.u32 %v552_v8, %v550_v31  ;;  %v698_v24 = vshrl.u32 %v697_v61, 23  ;;  %vm488_vm4 = vcmp.lt.s32.totalorder %v1330_v20, 0  ;;  %v856_v23 = vadd.s32 1, %v1555_v62 }
 0x12b   :  { %vm685_vm5 = vcmp.lt.s32.totalorder %v684_v41, 2  ;;  %vm686_vm6 = vcmp.eq.s32.totalorder %v684_v41, 0  ;;  %v853_v3 = vmul.u32 %v846_v51, %v837_v48  ;;  %vm689_vm7 = vcmp.eq.s32.totalorder %v684_v41, 2 }
 0x12c   :  { %v554_v12 = vclz %v940_v17  ;;  %v947_v34 = vadd.s32 4294967169, %v698_v24  ;;  %v857_v7 = vsel %vm855_vm2, %v856_v23, %v1555_v62  ;;  %v573_v4 = vsel %vm488_vm4, %v572_v49, %v548_v22 }
 0x12d   :  { %v858_v25 = vadd.s32 %v857_v7, %v853_v3  ;;  %v694_v18 = vand.u32 2147483647, %v1546_v55  ;;  %v542_v43 = vadd.s32 %v1498_v53, %v1484_v6  ;;  %v575_v58 = vsel %vm1563_vm3, 0, %v573_v4 }
 0x12e   :  { %v1011_v11 = vpop.eup %1010  ;;  %v941_v1 = vadd.s32 4294967294, %v554_v12  ;;  %v704_v30 = vadd.s32 1, %v947_v34  ;;  %v579_v0 = vadd.s32 3, %v575_v58 }
 0x12f   :  { %v1013_v5 = vpop.eup %1012  ;;  %v690_v10 = vxor.u32 2147483648, %v1011_v11  ;;  %v859_v19 = vadd.s32 536870912, %v858_v25  ;;  %v701_v53 = vand.u32 8388607, %v694_v18 }
 0x130   :  { %v687_v28 = vxor.u32 2147483648, %v1013_v5  ;;  %vm942_vm8 = vcmp.lt.s32.totalorder %v941_v1, 0  ;;  %vm705_vm9 = vcmp.gt.s32.totalorder %v704_v30, 0 }
 0x131   :  { %v691_v56 = vsel %vm689_vm7, %v690_v10, %v1013_v5  ;;  %v557_v36 = vsel %vm942_vm8, 0, %v941_v1  ;;  %v706_v22 = vsel %vm705_vm9, %v704_v30, 0  ;;  %v1584_v6 = vshrl.u32 %v859_v19, 30 }
 0x132   :  { %v688_v27 = vsel %vm686_vm6, %v1011_v11, %v687_v28  ;;  %v558_v2 = vsub.s32 32, %v557_v36  ;;  %v562_v35 = vsub.s32 4294967266, %v557_v36  ;;  %v559_v63 = vshll.u32 %v550_v31, %v557_v36 }
 0x133   :  { %v692_v38 = vsel %vm685_vm5, %v688_v27, %v691_v56  ;;  %v708_v13 = vand.u32 31, %v706_v22  ;;  %v861_v33 = vshll.u32 %v1584_v6, 30  ;;  %v702_v16 = vor.u32 8388608, %v701_v53 }
 0x134   :  { %v693_v9 = vsel %vm682_vm14, nan, %v692_v38  ;;  %v560_v14 = vshrl.u32 %v542_v43, %v558_v2  ;;  %v563_v15 = vadd.s32 127, %v562_v35  ;;  %v707_v48 = vshrl.u32 %v706_v22, 5 }
 0x135   :  { %v911_v21 = vsel %vm904_vm11, %v1192_v26, %v693_v9  ;;  %v709_v59 = vsub.s32 32, %v708_v13  ;;  %v854_v26 = vadd.s32 %v1554_v60, %v1551_v52  ;;  %v862_v50 = vsub.s32 %v858_v25, %v861_v33 }
 0x136   :  { %919 = vst.msk [vmem:[%s1666_s3 + $0x20] sm:$0xff] %vm914_vm13, %v911_v21  ;;  %v561_v47 = vor.u32 %v560_v14, %v559_v63  ;;  %v564_v51 = vshll.u32 %v563_v15, 23  ;;  %v711_v24 = vshll.u32 %v1030_v32, %v708_v13  ;;  %v714_v12 = vshll.u32 %v1031_v37, %v708_v13 }
 0x137   :  { %v712_v8 = vshrl.u32 %v1031_v37, %v709_v59  ;;  %v715_v61 = vshrl.u32 %v1032_v39, %v709_v59  ;;  %v718_v41 = vshrl.u32 %v1033_v44, %v709_v59  ;;  %v864_v17 = vsub.s32 0, %v862_v50 }
 0x138   :  { %v565_v31 = vor.u32 4788187, %v564_v51  ;;  %v568_v62 = vcvt.s32.f32 %v561_v47  ;;  %v717_v23 = vshll.u32 %v1032_v39, %v708_v13  ;;  %v720_v52 = vshll.u32 %v1033_v44, %v708_v13 }
 0x139   :  { %v721_v60 = vshrl.u32 %v1034_v46, %v709_v59  ;;  %v952_v34 = vmin.u32 %v864_v17, %v862_v50  ;;  %v713_v11 = vor.u32 %v712_v8, %v711_v24  ;;  %v716_v1 = vor.u32 %v715_v61, %v714_v12 }
 0x13a   :  { %v566_v29 = vand.u32 2147483647, %v565_v31  ;;  %v724_v3 = vshrl.u32 %v1035_v54, %v709_v59  ;;  %v719_v10 = vor.u32 %v718_v41, %v717_v23  ;;  %v723_v30 = vshll.u32 %v1034_v46, %v708_v13 }
 0x13b   :  { %v722_v7 = vor.u32 %v721_v60, %v720_v52  ;;  %v866_v28 = vclz %v952_v34  ;;  %vm726_vm10 = vcmp.lt.s32.totalorder %v707_v48, 1  ;;  %vm727_vm12 = vcmp.lt.s32.totalorder %v707_v48, 2 }
 0x13c   :  { %v569_v49 = vmul.f32 %v568_v62, %v566_v29  ;;  %v742_v37 = vshll.u32 %v702_v16, 8  ;;  %v710_v44 = vshrl.u32 %v1030_v32, %v709_v59  ;;  %v725_v4 = vor.u32 %v724_v3, %v723_v30 }
 0x13d   :  { %vm728_vm15 = vcmp.lt.s32.totalorder %v707_v48, 3  ;;  %v953_v25 = vadd.s32 4294967294, %v866_v28  ;;  %vm729_vm0 = vcmp.lt.s32.totalorder %v707_v48, 4  ;;  %v734_v56 = vsel %vm726_vm10, %v713_v11, %v716_v1 }
 0x13e   :  { %v570_v5 = vxor.u32 2147483648, %v569_v49  ;;  %v731_v46 = vsel %vm729_vm0, %v719_v10, 2102212464  ;;  %v735_v36 = vsel %vm729_vm0, %v722_v7, 920167782  ;;  %v738_v27 = vsel %vm726_vm10, %v716_v1, %v719_v10 }
 0x13f   :  { %vm954_vm1 = vcmp.lt.s32.totalorder %v953_v25, 0  ;;  %v736_v43 = vsel %vm728_vm15, %v719_v10, %v735_v36  ;;  %v739_v32 = vsel %vm729_vm0, %v725_v4, 1326507024  ;;  %v730_v35 = vsel %vm726_vm10, %v710_v44, %v713_v11 }
 0x140   :  { %v571_v39 = vsel %vm488_vm4, %v570_v5, %v569_v49  ;;  %v869_v2 = vsel %vm954_vm1, 0, %v953_v25  ;;  %v737_v42 = vsel %vm727_vm12, %v734_v56, %v736_v43  ;;  %v740_v38 = vsel %vm728_vm15, %v722_v7, %v739_v32 }
 0x141   :  { %v574_v54 = vsel %vm1563_vm3, %v1330_v20, %v571_v39  ;;  %v870_v58 = vsub.s32 32, %v869_v2  ;;  %v874_v19 = vsub.s32 4294967266, %v869_v2  ;;  %v732_v22 = vsel %vm728_vm15, %v716_v1, %v731_v46 }
 0x142   :  { %1014 = vcosq.f32 %v574_v54  ;;  %v741_v9 = vsel %vm727_vm12, %v738_v27, %v740_v38  ;;  %v1621_v15 = vmul.u32.u64.low %v742_v37, %v737_v42  ;;  %v1622_v21 = vmul.u32.u64.high %v742_v37, %v737_v42, %v1621_v15 }
 0x143   :  { %1016 = vsinq.f32 %v574_v54  ;;  %v1618_v63 = vmul.u32.u64.low %v742_v37, %v741_v9  ;;  %v1619_v14 = vmul.u32.u64.high %v742_v37, %v741_v9, %v1618_v63  ;;  %v871_v53 = vshll.u32 %v862_v50, %v869_v2 }
 0x144   :  { %v872_v13 = vshrl.u32 %v854_v26, %v870_v58  ;;  %v875_v47 = vadd.s32 127, %v874_v19  ;;  %v733_v51 = vsel %vm727_vm12, %v730_v35, %v732_v22  ;;  %v580_v31 = vand.u32 3, %v579_v0 }
 0x145   :  { %vm751_vm14 = vc.u32 %v1619_v14, %v1621_v15  ;;  %v752_v16 = vadd.s32 1, %v1622_v21  ;;  %v749_v29 = vmul.u32 %v742_v37, %v733_v51  ;;  %v884_v48 = vsub.s32 4, %v1584_v6 }
 0x146   :  { %v873_v33 = vor.u32 %v872_v13, %v871_v53  ;;  %v876_v59 = vshll.u32 %v875_v47, 23  ;;  %vm585_vm2 = vcmp.eq.s32.totalorder %v580_v31, 2  ;;  %vm582_vm3 = vcmp.eq.s32.totalorder %v580_v31, 0 }
 0x147   :  { %v753_v61 = vsel %vm751_vm14, %v752_v16, %v1622_v21  ;;  %vm578_vm4 = vweird.f32 %v1330_v20  ;;  %vm581_vm5 = vcmp.lt.s32.totalorder %v580_v31, 2  ;;  %vm800_vm6 = vcmp.lt.s32.totalorder %v1409_v45, 0 }
 0x148   :  { %v877_v8 = vor.u32 4788187, %v876_v59  ;;  %v880_v50 = vcvt.s32.f32 %v873_v33  ;;  %v754_v26 = vadd.s32 %v753_v61, %v749_v29  ;;  %v885_v3 = vsel %vm800_vm6, %v884_v48, %v1584_v6 }
 0x149   :  { %vm799_vm7 = vcmp.le.f32.partialorder %v798_v57, 0.7853982  ;;  %v750_v27 = vadd.s32 %v1621_v15, %v1619_v14  ;;  %vm890_vm15 = vweird.f32 %v1409_v45  ;;  %vm696_vm0 = vcmp.lt.s32.totalorder %v1546_v55, 0 }
 0x14a   :  { %v878_v24 = vand.u32 2147483647, %v877_v8  ;;  %v755_v23 = vadd.s32 536870912, %v754_v26  ;;  %v887_v28 = vsel %vm799_vm7, 0, %v885_v3  ;;  %vm695_vm1 = vcmp.le.f32.partialorder %v694_v18, 0.7853982 }
 0x14b   :  { %v891_v39 = vadd.s32 3, %v887_v28 }
 0x14c   :  { %v1015_v62 = vpop.eup %1014  ;;  %v881_v49 = vmul.f32 %v880_v50, %v878_v24  ;;  %v756_v11 = vshrl.u32 %v755_v23, 30 }
 0x14d   :  { %v1017_v41 = vpop.eup %1016  ;;  %v586_v17 = vxor.u32 2147483648, %v1015_v62  ;;  %v892_v4 = vand.u32 3, %v891_v39 }
 0x14e   :  { %v583_v12 = vxor.u32 2147483648, %v1017_v41  ;;  %v882_v34 = vxor.u32 2147483648, %v881_v49  ;;  %v757_v7 = vshll.u32 %v756_v11, 30  ;;  %v780_v47 = vsub.s32 4, %v756_v11 }
 0x14f   :  { %v587_v0 = vsel %vm585_vm2, %v586_v17, %v1017_v41  ;;  %vm897_vm9 = vcmp.eq.s32.totalorder %v892_v4, 2  ;;  %vm893_vm10 = vcmp.lt.s32.totalorder %v892_v4, 2  ;;  %vm894_vm12 = vcmp.eq.s32.totalorder %v892_v4, 0 }
 0x150   :  { %v584_v52 = vsel %vm582_vm3, %v1015_v62, %v583_v12  ;;  %v883_v10 = vsel %vm800_vm6, %v882_v34, %v881_v49  ;;  %v758_v37 = vsub.s32 %v754_v26, %v757_v7  ;;  %v781_v59 = vsel %vm696_vm0, %v780_v47, %v756_v11 }
 0x151   :  { %v588_v60 = vsel %vm581_vm5, %v584_v52, %v587_v0  ;;  %v886_v30 = vsel %vm799_vm7, %v1409_v45, %v883_v10  ;;  %v783_v31 = vsel %vm695_vm1, 0, %v781_v59 }
 0x152   :  { %v589_v1 = vsel %vm578_vm4, nan, %v588_v60  ;;  %1018 = vcosq.f32 %v886_v30  ;;  %v760_v6 = vsub.s32 0, %v758_v37  ;;  %v787_v16 = vadd.s32 3, %v783_v31 }
 0x153   :  { %v910_v5 = vsel %vm904_vm11, %v1330_v20, %v589_v1  ;;  %1020 = vsinq.f32 %v886_v30  ;;  %vm786_vm4 = vweird.f32 %v1546_v55 }
 0x154   :  { %918 = vst.msk [vmem:[%s1666_s3 + $0x18] sm:$0xff] %vm914_vm13, %v910_v5  ;;  %v948_v44 = vmin.u32 %v760_v6, %v758_v37  ;;  %v788_v8 = vand.u32 3, %v787_v16 }
 0x156   :  { %v762_v20 = vclz %v948_v44  ;;  %vm793_vm14 = vcmp.eq.s32.totalorder %v788_v8, 2  ;;  %vm790_vm2 = vcmp.eq.s32.totalorder %v788_v8, 0  ;;  %vm789_vm3 = vcmp.lt.s32.totalorder %v788_v8, 2 }
 0x158   :  { %v949_v54 = vadd.s32 4294967294, %v762_v20 }
 0x15a   :  { %vm950_vm8 = vcmp.lt.s32.totalorder %v949_v54, 0 }
 0x15b   :  { %v765_v46 = vsel %vm950_vm8, 0, %v949_v54 }
 0x15c   :  { %v1019_v57 = vpop.eup %1018  ;;  %v766_v43 = vsub.s32 32, %v765_v46  ;;  %v770_v32 = vsub.s32 4294967266, %v765_v46  ;;  %v767_v42 = vshll.u32 %v758_v37, %v765_v46 }
 0x15d   :  { %v1021_v25 = vpop.eup %1020  ;;  %v898_v56 = vxor.u32 2147483648, %v1019_v57 }
 0x15e   :  { %v895_v36 = vxor.u32 2147483648, %v1021_v25  ;;  %v768_v38 = vshrl.u32 %v750_v27, %v766_v43  ;;  %v771_v58 = vadd.s32 127, %v770_v32 }
 0x15f   :  { %v899_v2 = vsel %vm897_vm9, %v898_v56, %v1021_v25 }
 0x160   :  { %v896_v35 = vsel %vm894_vm12, %v1019_v57, %v895_v36  ;;  %v769_v9 = vor.u32 %v768_v38, %v767_v42  ;;  %v772_v63 = vshll.u32 %v771_v58, 23 }
 0x161   :  { %v900_v19 = vsel %vm893_vm10, %v896_v35, %v899_v2 }
 0x162   :  { %v901_v22 = vsel %vm890_vm15, nan, %v900_v19  ;;  %v773_v14 = vor.u32 4788187, %v772_v63  ;;  %v776_v53 = vcvt.s32.f32 %v769_v9 }
 0x163   :  { %v913_v21 = vsel %vm904_vm11, %v1409_v45, %v901_v22 }
 0x164   :  { %921 = vst.msk [vmem:[%s1666_s3 + $0x30] sm:$0xff] %vm914_vm13, %v913_v21  ;;  %v774_v15 = vand.u32 2147483647, %v773_v14 }
 0x166   :  { %v777_v13 = vmul.f32 %v776_v53, %v774_v15 }
 0x168   :  { %v778_v51 = vxor.u32 2147483648, %v777_v13 }
 0x16a   :  { %v779_v33 = vsel %vm696_vm0, %v778_v51, %v777_v13 }
 0x16b   :  { %v782_v45 = vsel %vm695_vm1, %v1546_v55, %v779_v33 }
 0x16c   :  { %1022 = vcosq.f32 %v782_v45 }
 0x16d   :  { %1024 = vsinq.f32 %v782_v45 }
 0x176   :  { %v1023_v29 = vpop.eup %1022 }
 0x177   :  { %v1025_v62 = vpop.eup %1024  ;;  %v794_v61 = vxor.u32 2147483648, %v1023_v29 }
 0x178   :  { %v791_v41 = vxor.u32 2147483648, %v1025_v62 }
 0x179   :  { %v795_v17 = vsel %vm793_vm14, %v794_v61, %v1025_v62 }
 0x17a   :  { %v792_v24 = vsel %vm790_vm2, %v1023_v29, %v791_v41 }
 0x17b   :  { %v796_v18 = vsel %vm789_vm3, %v792_v24, %v795_v17 }
 0x17c   :  { %v797_v50 = vsel %vm786_vm4, nan, %v796_v18 }
 0x17d   :  { %v912_v26 = vsel %vm904_vm11, %v1546_v55, %v797_v50 }
 0x17e   :  { %920 = vst.msk [vmem:[%s1666_s3 + $0x28] sm:$0xff] %vm914_vm13, %v912_v26 }

</bundles_post_ra>
